<compile_context>
chip_gen: v6e
topology: v6e:2x2x1
jax: 0.10.0
libtpu: 0.0.40
codegen_flags: <defaults>
</compile_context>

<pallas_src>
import jax
import jax.numpy as jnp
from jax.experimental import pallas as pl
from jax.experimental.pallas import tpu as pltpu


def gravity_kernel(g_ref, b_ref, x_ref, p_ref, y_ref):
    # g_ref: (1,) SMEM   learned scale G
    # b_ref: (1,) SMEM   linear bias
    # x_ref: (tile_r, 384) VMEM  128 interleaved samples per row
    # p_ref: (384, 128)   VMEM  pattern matrix, P[3j+f, j] = w[f]
    # y_ref: (tile_r, 128) VMEM  one output per sample, lane-dense
    logx = jnp.log(x_ref[...] + jnp.float32(1e-10))            # VPU/EUP, 3 logs/sample
    logy = jnp.dot(logx, p_ref[...],                            # tiny MXU compaction
                   preferred_element_type=jnp.float32)          # (tile_r, 128)
    y_ref[...] = g_ref[0] * jnp.exp(logy + b_ref[0])            # 1 exp/sample


def gravity_forward(x, weight, bias, g, *, max_rows_per_block=2048):
    """x: (..., 3) float -> (..., 1) float32. Matches PyTorch GRAVITY.forward."""
    orig_shape = x.shape
    assert orig_shape[-1] == 3, "GRAVITY expects feature dim of 3"

    x2 = x.reshape(-1, 3).astype(jnp.float32)
    n = x2.shape[0]

    w_flat = weight.reshape(3).astype(jnp.float32)
    b_arr = bias.reshape(1).astype(jnp.float32)
    g_arr = g.reshape(1).astype(jnp.float32)

    n_main = (n // 128) * 128          # 128-sample-aligned prefix handled by the kernel
    rows = n_main // 128
    pieces = []

    if rows > 0:
        # Zero-cost view (row-major bitcast); interleaving stays in place.
        # (When n is unaligned the prefix slice is the only extra copy, and the
        #  tail below stays < 128 samples.)
        x_main = (x2 if n_main == n else x2[:n_main]).reshape(rows, 384)

        # --- block-size selection ------------------------------------------
        tile_r = min(max_rows_per_block, rows)
        # Prefer >= 8 grid steps while keeping blocks >= 1024 rows (~1.5 MiB in/step).
        while tile_r > 1024 and (rows + tile_r - 1) // tile_r < 8:
            tile_r //= 2
        # Guarantee >= 2 grid steps down to 8-row blocks (v7x: 2 TensorCores).
        while tile_r > 8 and (rows + tile_r - 1) // tile_r < 2:
            tile_r //= 2
        if rows >= 8:
            tile_r = max(8, (tile_r // 8) * 8)   # keep (8,128) sublane alignment
        else:
            tile_r = rows                        # full-extent (<8 rows) block
        grid = (pl.cdiv(rows, tile_r),)

        # Pattern matrix: P[3j+f, j] = w[f]; resident in VMEM for the whole grid.
        eye128 = jnp.eye(128, dtype=jnp.float32)
        pat = (eye128[:, None, :] * w_flat[None, :, None]).reshape(384, 128)

        cost = pl.CostEstimate(flops=8 * n_main,
                               transcendentals=4 * n_main,
                               bytes_accessed=16 * n_main)

        y_main = pl.pallas_call(
            gravity_kernel,
            out_shape=jax.ShapeDtypeStruct((rows, 128), jnp.float32),
            grid=grid,
            in_specs=[
                pl.BlockSpec(memory_space=pltpu.MemorySpace.SMEM),   # G
                pl.BlockSpec(memory_space=pltpu.MemorySpace.SMEM),   # bias
                pl.BlockSpec((tile_r, 384), lambda i: (i, 0)),       # samples
                pl.BlockSpec((384, 128), lambda i: (0, 0)),          # pattern (resident)
            ],
            out_specs=pl.BlockSpec((tile_r, 128), lambda i: (i, 0)),
            compiler_params=pltpu.CompilerParams(
                dimension_semantics=("parallel",)),
            cost_estimate=cost,
        )(g_arr, b_arr, x_main, pat)
        pieces.append(y_main.reshape(n_main))

    n_tail = n - n_main
    if n_tail:
        # < 128 leftover samples: cheaper in plain jnp than padding whole arrays.
        x_tail = x2[n_main:]
        logy_tail = jnp.log(x_tail + jnp.float32(1e-10)) @ w_flat + b_arr[0]
        pieces.append(g_arr[0] * jnp.exp(logy_tail))

    y = pieces[0] if len(pieces) == 1 else jnp.concatenate(pieces)
    return y.reshape(*orig_shape[:-1], 1)


if __name__ == "__main__":
    key = jax.random.PRNGKey(0)
    k_x, k_w, k_b = jax.random.split(key, 3)

    # nn.Linear(3, 1)-style deterministic init: uniform(-1/sqrt(3), 1/sqrt(3))
    bound = 1.0 / jnp.sqrt(3.0)
    weight = jax.random.uniform(k_w, (1, 3), minval=-bound, maxval=bound,
                                dtype=jnp.float32)
    bias = jax.random.uniform(k_b, (1,), minval=-bound, maxval=bound,
                              dtype=jnp.float32)
    g = jnp.array([1.0], dtype=jnp.float32)          # self.G

    # Small but kernel-exercising input: 2*2048 = 4096 samples -> 32 rows of 384,
    # tile_r = 16 -> grid = (2,) so both TensorCores get work on v7x.
    x = jax.random.uniform(k_x, (2, 2048, 3), minval=0.1, maxval=10.0,
                           dtype=jnp.float32)

    fwd = jax.jit(gravity_forward)
    y = jax.block_until_ready(fwd(x, weight, bias, g))

    # Reference check against the original (unfolded) formulation.
    y_ref = g * jnp.exp(jnp.log(x + 1e-10) @ weight.T + bias)
    assert y.shape == (2, 2048, 1)
    assert jnp.allclose(y, y_ref, rtol=1e-5, atol=1e-5), \
        float(jnp.max(jnp.abs(y - y_ref)))

    # Exercise the unaligned (<128-sample, pure-jnp tail) path as well.
    x_small = jax.random.uniform(k_x, (2, 5, 3), minval=0.1, maxval=10.0,
                                 dtype=jnp.float32)
    y_small = jax.block_until_ready(gravity_forward(x_small, weight, bias, g))
    y_small_ref = g * jnp.exp(jnp.log(x_small + 1e-10) @ weight.T + bias)
    assert y_small.shape == (2, 5, 1)
    assert jnp.allclose(y_small, y_small_ref, rtol=1e-5, atol=1e-5)

    print("KERNEL_OK")
</pallas_src>

<mosaic_0001>
module attributes {stable_mosaic.version = 11 : i64} {
  func.func @gravity_kernel(%arg0: i32, %arg1: memref<1xf32, #tpu.memory_space<smem>>, %arg2: memref<1xf32, #tpu.memory_space<smem>>, %arg3: memref<16x384xf32, #tpu.memory_space<vmem>>, %arg4: memref<384x128xf32, #tpu.memory_space<vmem>>, %arg5: memref<16x128xf32, #tpu.memory_space<vmem>>) attributes {dimension_semantics = [#tpu.dimension_semantics<parallel>], iteration_bounds = array<i64: 2>, scalar_prefetch = 0 : i64, scratch_operands = 0 : i64, tpu.core_type = #tpu.core_type<tc>, window_params = [{transform_indices = @transform_0, window_bounds = array<i64: 1>}, {transform_indices = @transform_1, window_bounds = array<i64: 1>}, {transform_indices = @transform_2, window_bounds = array<i64: 16, 384>}, {pipeline_mode = #tpu.pipeline_mode<synchronous>, transform_indices = @transform_3, window_bounds = array<i64: 384, 128>}, {transform_indices = @transform_4, window_bounds = array<i64: 16, 128>}]} {
    %c0 = arith.constant 0 : index
    %c0_0 = arith.constant 0 : index
    %0 = vector.load %arg3[%c0, %c0_0] : memref<16x384xf32, #tpu.memory_space<vmem>>, vector<16x384xf32>
    %cst = arith.constant 1.000000e-10 : f32
    %1 = vector.broadcast %cst : f32 to vector<16x384xf32>
    %2 = arith.addf %0, %1 : vector<16x384xf32>
    %3 = math.log %2 : vector<16x384xf32>
    %c0_1 = arith.constant 0 : index
    %c0_2 = arith.constant 0 : index
    %4 = vector.load %arg4[%c0_1, %c0_2] : memref<384x128xf32, #tpu.memory_space<vmem>>, vector<384x128xf32>
    %cst_3 = arith.constant dense<0.000000e+00> : vector<16x128xf32>
    %5 = tpu.matmul %3, %4, %cst_3 {dimension_numbers = #tpu.dot_dimension_numbers<[1], [0], [0], [1], [0, 0, 1, 1], [], []>} : vector<16x384xf32>, vector<384x128xf32>, vector<16x128xf32> -> vector<16x128xf32>
    %c0_4 = arith.constant 0 : index
    %6 = memref.load %arg1[%c0_4] : memref<1xf32, #tpu.memory_space<smem>>
    %c0_5 = arith.constant 0 : index
    %7 = memref.load %arg2[%c0_5] : memref<1xf32, #tpu.memory_space<smem>>
    %8 = vector.broadcast %7 : f32 to vector<16x128xf32>
    %9 = arith.addf %5, %8 : vector<16x128xf32>
    %10 = math.exp %9 : vector<16x128xf32>
    %11 = vector.broadcast %6 : f32 to vector<16x128xf32>
    %12 = arith.mulf %11, %10 : vector<16x128xf32>
    %c0_6 = arith.constant 0 : index
    %c0_7 = arith.constant 0 : index
    %13 = vector.load %arg5[%c0_6, %c0_7] : memref<16x128xf32, #tpu.memory_space<vmem>>, vector<16x128xf32>
    tpu.vector_store %arg5[%c0_6, %c0_7], %12 {strides = array<i32>} : memref<16x128xf32, #tpu.memory_space<vmem>>, vector<16x128xf32>,
    return
  }
  func.func @transform_0(%arg0: i32) -> i32 {
    %c0_i32 = arith.constant 0 : i32
    %c0_i32_0 = arith.constant 0 : i32
    return %c0_i32 : i32
  }
  func.func @transform_1(%arg0: i32) -> i32 {
    %c0_i32 = arith.constant 0 : i32
    %c0_i32_0 = arith.constant 0 : i32
    return %c0_i32 : i32
  }
  func.func @transform_2(%arg0: i32) -> (i32, i32) {
    %c0_i32 = arith.constant 0 : i32
    %c0_i32_0 = arith.constant 0 : i32
    return %arg0, %c0_i32 : i32, i32
  }
  func.func @transform_3(%arg0: i32) -> (i32, i32) {
    %c0_i32 = arith.constant 0 : i32
    %c0_i32_0 = arith.constant 0 : i32
    %c0_i32_1 = arith.constant 0 : i32
    return %c0_i32, %c0_i32_0 : i32, i32
  }
  func.func @transform_4(%arg0: i32) -> (i32, i32) {
    %c0_i32 = arith.constant 0 : i32
    %c0_i32_0 = arith.constant 0 : i32
    return %arg0, %c0_i32 : i32, i32
  }
}

</mosaic_0001>

<bundles_post_ra>
// kernel: gravity_forward.1
= control target key start
LH: loop header
LB: loop body
LE: loop exit
PB: predicated region body
PF: predicated region fallthrough
CT: control target
= control target key end

     0   :  { %s1028_s0 = inlined_call_operand.<no memory space> [shape: f32[1], index: 0, kind: input, shape index: {}]   ;;  %s1029_s1 = inlined_call_operand.<no memory space> [shape: f32[1], index: 1, kind: input, shape index: {}]   ;;  %s1030_s2 = inlined_call_operand.vmem [shape: f32[32,384], index: 2, kind: input, shape index: {}]   ;;  %s1031_s3 = inlined_call_operand.vmem [shape: f32[384,128], index: 3, kind: input, shape index: {}]   ;;  %s1032_s4 = inlined_call_operand.hbm [shape: f32[32,128], index: 4, kind: output, shape index: {}]  }
   0x1   :  { %9 = sst [smem:[#allocation2]] %s1028_s0 }
   0x2   :  { %10 = sst [smem:[#allocation3]] %s1029_s1 }
   0x3   :  { %11 = vsyncpa [#allocation5], 0 }
   0x4   :  { %13 = vsyncpa [#allocation5 + $0x1], 0  ;;  %s772_s19 = smov 0   ;;  %s774_s20 = smov 0  }
   0x5   :  { %s776_s21 = smov 0   ;;  %s778_s22 = smov 0  }
   0x6 LB: > { %s793_s0 = sadd.s32 4294967295, %s736_s22   ;;  %s514_s1 = sadd.s32 4294967294, %s736_s22   ;;  %s736_s22 = sphi %s778_s22, %s1038_s22   ;;  %s732_s21 = sphi %s776_s21, %s1037_s21   ;;  %s728_s20 = sphi %s774_s20, %s1036_s20   ;;  %s724_s19 = sphi %s772_s19, %s1035_s19  }
   0x7   : > { %s797_s23 = sadd.s32 1, %s736_s22   ;;  %s115_s24 = sadd.s32 1, %s732_s21 }
   0x8   : > { %s112_s25 = ssub.s32 %s736_s22, %s797_s23  ;;  %p125_p0 = scmp.ne.s32.totalorder %s732_s21, %s728_s20 }
   0x9   : > { %p113_p1 = scmp.eq.s32.totalorder %s112_s25, 0  ;;  %p126_p2 = scmp.eq.s32.totalorder %s793_s0, 1 }
   0xa   : > { %p131_p3 = scmp.ne.s32.totalorder %s728_s20, %s724_s19  ;;  %p132_p4 = scmp.eq.s32.totalorder %s514_s1, 1 }
   0xb   : > { %s808_s26 = scalar_select %p113_p1, %s732_s21, %s115_s24  }
   0xc   : > { %p810_p5 = por %p126_p2, %p125_p0  ;;  %p814_p6 = por %p132_p4, %p131_p3 }
   0xd   : > { %p517_p7 = scmp.ge.s32.totalorder %s736_s22, 1  ;;  %p169_p8 = scmp.lt.s32.totalorder %s736_s22, 3 }
   0xf   : > { %p170_p9 = pnand %p517_p7, %p169_p8 }
  0x10   : > { %s519_s9 = sshll.u32 (!%p170_p9), %s793_s0, 1  ;;  %s277_s10 = sld [smem:[#allocation3]] (!%p170_p9) }
  0x11   : > { %173 = sbr.rel (%p170_p9) target bundleno = 293 (0x125), region = 36  ;;  %p197_p10 = scmp.lt.s32.totalorder (!%p170_p9), %s519_s9, 3 }
  0x12   : > { %s276_s11 = sld [smem:[#allocation2]] (!%p170_p9)  ;;  %s193_s12 = sand.u32 (!%p170_p9), 1, %s728_s20  }
  0x13   : > { %s518_s13 = sshll.u32 (!%p170_p9), %s193_s12, 4  ;;  %s526_s15 = sshll.u32 (!%p170_p9), %s793_s0, 8 }
  0x14   : > { %s195_s16 = scalar_lea.vmem (!%p170_p9), [#allocation4], %s518_s13  ;;  %s984_s25 = scalar_lea.hbm (!%p170_p9), %s1032_s4, %s526_s15 }
  0x15   : > { %s452_s17 = sshll.u32 (!%p170_p9), %s195_s16, 4  ;;  %s738_s0 = smov (!%p170_p9), [#allocation4]   ;;  %s986_s17 = int_to_ptr.vmem [resolvable:$true] %s452_s17 }
  0x16   : > { %v259_v0 = vld [vmem:[%s1031_s3 + $0xf8] sm:$0xff]  ;;  %v258_v2 = vld [vmem:[%s1031_s3 + $0xf0] sm:$0xff]  ;;  %v257_v5 = vld [vmem:[%s1031_s3 + $0xe8] sm:$0xff]  ;;  %s1040_s9 = smov (!%p197_p10, %s519_s9), 3  ;;  %s676_s29 = scalar_lea.vmem %s986_s17, 256 }
  0x17   : > { %v243_v1 = vld [vmem:[%s1031_s3 + $0x78] sm:$0xff]  ;;  %527 = vmatprep.subr.mxu0 %v259_v0  ;;  %v242_v3 = vld [vmem:[%s1031_s3 + $0x70] sm:$0xff]  ;;  %v241_v7 = vld [vmem:[%s1031_s3 + $0x68] sm:$0xff]  ;;  %s618_s18 = smul.u32 24, %s1040_s9  ;;  %p677_p11 = scmp.ne.s32.totalorder %s986_s17, %s676_s29 }
  0x18   : > { %v275_v4 = vld [vmem:[%s1031_s3 + $0x178] sm:$0xff]  ;;  %528 = vmatpush3.msra.mxu0 %v243_v1  ;;  %v274_v6 = vld [vmem:[%s1031_s3 + $0x170] sm:$0xff]  ;;  %v273_v8 = vld [vmem:[%s1031_s3 + $0x168] sm:$0xff]  ;;  %s680_s30 = sshll.u32 %s738_s0, 4  ;;  %s681_s30 = int_to_ptr.vmem [resolvable:$false] %s680_s30 }
  0x19   : > { %583 = vmatprep.subr.mxu1 %v275_v4  ;;  %529 = vmatprep.subr.mxu0 %v258_v2  ;;  %v256_v9 = vld [vmem:[%s1031_s3 + $0xe0] sm:$0xff]  ;;  %v255_v12 = vld [vmem:[%s1031_s3 + $0xd8] sm:$0xff]  ;;  %v254_v15 = vld [vmem:[%s1031_s3 + $0xd0] sm:$0xff]  ;;  %s893_s14 = scalar_lea.vmem %s1030_s2, %s618_s18  ;;  %s988_s18 = scalar_lea.sflag [#allocation5], %s193_s12 }
  0x1a   : > { %584 = vmatpush3.msra.mxu1 %v275_v4  ;;  %530 = vmatpush3.msra.mxu0 %v242_v3  ;;  %v240_v10 = vld [vmem:[%s1031_s3 + $0x60] sm:$0xff]  ;;  %v239_v13 = vld [vmem:[%s1031_s3 + $0x58] sm:$0xff]  ;;  %v238_v16 = vld [vmem:[%s1031_s3 + $0x50] sm:$0xff]  ;;  %p678_p12 = pnand %p677_p11, %p810_p5  ;;  %s682_s5 = scalar_lea.vmem %s681_s30, 512 }
  0x1b   : > { %585 = vmatprep.subr.mxu1 %v274_v6  ;;  %531 = vmatprep.subr.mxu0 %v257_v5  ;;  %v272_v11 = vld [vmem:[%s1031_s3 + $0x160] sm:$0xff]  ;;  %v271_v14 = vld [vmem:[%s1031_s3 + $0x158] sm:$0xff]  ;;  %v270_v17 = vld [vmem:[%s1031_s3 + $0x150] sm:$0xff]  ;;  %p683_p0 = scmp.lt.s32.totalorder %s986_s17, %s681_s30  ;;  %p684_p1 = scmp.lt.s32.totalorder %s682_s5, %s676_s29 }
  0x1c   : > { %586 = vmatpush3.msra.mxu1 %v274_v6  ;;  %532 = vmatpush3.msra.mxu0 %v241_v7  ;;  %v253_v18 = vld [vmem:[%s1031_s3 + $0xc8] sm:$0xff]  ;;  %v252_v21 = vld [vmem:[%s1031_s3 + $0xc0] sm:$0xff]  ;;  %v251_v24 = vld [vmem:[%s1031_s3 + $0xb8] sm:$0xff]  ;;  %p679_p13 = pneg %p678_p12 }
  0x1d   : > { %587 = vmatprep.subr.mxu1 %v273_v8  ;;  %533 = vmatprep.subr.mxu0 %v256_v9  ;;  %v237_v19 = vld [vmem:[%s1031_s3 + $0x48] sm:$0xff]  ;;  %v236_v22 = vld [vmem:[%s1031_s3 + $0x40] sm:$0xff]  ;;  %v235_v25 = vld [vmem:[%s1031_s3 + $0x38] sm:$0xff]  ;;  %p685_p2 = por %p684_p1, %p683_p0 }
  0x1e   : > { %588 = vmatpush3.msra.mxu1 %v273_v8  ;;  %534 = vmatpush3.msra.mxu0 %v240_v10  ;;  %v269_v20 = vld [vmem:[%s1031_s3 + $0x148] sm:$0xff]  ;;  %v268_v23 = vld [vmem:[%s1031_s3 + $0x140] sm:$0xff]  ;;  %v250_v26 = vld [vmem:[%s1031_s3 + $0xb0] sm:$0xff]  ;;  %v278_v10 = vstv %s277_s10 }
  0x1f   : > { %589 = vmatprep.subr.mxu1 %v272_v11  ;;  %535 = vmatprep.subr.mxu0 %v255_v12  ;;  %v234_v27 = vld [vmem:[%s1031_s3 + $0x30] sm:$0xff]  ;;  %v267_v28 = vld [vmem:[%s1031_s3 + $0x138] sm:$0xff]  ;;  %v205_v29 = vld [vmem:[%s893_s14 + $0x8] sm:$0xff]  ;;  %p686_p3 = pnand %p685_p2, %p679_p13 }
  0x20   : > { %590 = vmatpush3.msra.mxu1 %v272_v11  ;;  %536 = vmatpush3.msra.mxu0 %v239_v13  ;;  %v204_v30 = vld [vmem:[%s893_s14] sm:$0xff]  ;;  %v249_v31 = vld [vmem:[%s1031_s3 + $0xa8] sm:$0xff]  ;;  %v266_v32 = vld [vmem:[%s1031_s3 + $0x130] sm:$0xff]  ;;  %v211_v33 = vadd.f32 1e-10, %v205_v29 }
  0x21   : > { %591 = vmatprep.subr.mxu1 %v271_v14  ;;  %537 = vmatprep.subr.mxu0 %v254_v15  ;;  %v210_v34 = vadd.f32 1e-10, %v204_v30  ;;  %v208_v35 = vld [vmem:[%s893_s14 + $0x20] sm:$0xff]  ;;  %v206_v36 = vld [vmem:[%s893_s14 + $0x10] sm:$0xff]  ;;  %v207_v37 = vld [vmem:[%s893_s14 + $0x18] sm:$0xff] }
  0x22   : > { %592 = vmatpush3.msra.mxu1 %v271_v14  ;;  %538 = vmatpush3.msra.mxu0 %v238_v16  ;;  %660 = vlog2.f32 %v211_v33  ;;  %v214_v38 = vadd.f32 1e-10, %v208_v35  ;;  %v212_v39 = vadd.f32 1e-10, %v206_v36  ;;  %v213_v40 = vadd.f32 1e-10, %v207_v37 }
  0x23   : > { %593 = vmatprep.subr.mxu1 %v270_v17  ;;  %539 = vmatprep.subr.mxu0 %v253_v18  ;;  %v233_v41 = vld [vmem:[%s1031_s3 + $0x28] sm:$0xff]  ;;  %662 = vlog2.f32 %v210_v34  ;;  %v248_v44 = vld [vmem:[%s1031_s3 + $0xa0] sm:$0xff]  ;;  %v247_v48 = vld [vmem:[%s1031_s3 + $0x98] sm:$0xff] }
  0x24   : > { %594 = vmatpush3.msra.mxu1 %v270_v17  ;;  %540 = vmatpush3.msra.mxu0 %v237_v19  ;;  %v265_v42 = vld [vmem:[%s1031_s3 + $0x128] sm:$0xff]  ;;  %664 = vlog2.f32 %v214_v38  ;;  %v232_v46 = vld [vmem:[%s1031_s3 + $0x20] sm:$0xff]  ;;  %v231_v49 = vld [vmem:[%s1031_s3 + $0x18] sm:$0xff] }
  0x25   : > { %595 = vmatprep.subr.mxu1 %v269_v20  ;;  %541 = vmatprep.subr.mxu0 %v252_v21  ;;  %v209_v43 = vld [vmem:[%s893_s14 + $0x28] sm:$0xff]  ;;  %v264_v47 = vld [vmem:[%s1031_s3 + $0x120] sm:$0xff]  ;;  %666 = vlog2.f32 %v212_v39  ;;  %v263_v50 = vld [vmem:[%s1031_s3 + $0x118] sm:$0xff] }
  0x26   : > { %596 = vmatpush3.msra.mxu1 %v269_v20  ;;  %542 = vmatpush3.msra.mxu0 %v236_v22  ;;  %v215_v45 = vadd.f32 1e-10, %v209_v43  ;;  %668 = vlog2.f32 %v213_v40  ;;  %v246_v51 = vld [vmem:[%s1031_s3 + $0x90] sm:$0xff]  ;;  %v245_v54 = vld [vmem:[%s1031_s3 + $0x88] sm:$0xff]  ;;  %v244_v57 = vld [vmem:[%s1031_s3 + $0x80] sm:$0xff] }
  0x27   : > { %597 = vmatprep.subr.mxu1 %v268_v23  ;;  %543 = vmatprep.subr.mxu0 %v251_v24  ;;  %v230_v52 = vld [vmem:[%s1031_s3 + $0x10] sm:$0xff]  ;;  %v229_v55 = vld [vmem:[%s1031_s3 + $0x8] sm:$0xff]  ;;  %v228_v58 = vld [vmem:[%s1031_s3] sm:$0xff] }
  0x28   : > { %598 = vmatpush3.msra.mxu1 %v268_v23  ;;  %544 = vmatpush3.msra.mxu0 %v235_v25  ;;  %670 = vlog2.f32 %v215_v45  ;;  %v262_v53 = vld [vmem:[%s1031_s3 + $0x110] sm:$0xff]  ;;  %v261_v56 = vld [vmem:[%s1031_s3 + $0x108] sm:$0xff]  ;;  %v260_v59 = vld [vmem:[%s1031_s3 + $0x100] sm:$0xff]  ;;  %v433_v23 = vstv %s276_s11 }
  0x29   : > { %599 = vmatprep.subr.mxu1 %v267_v28  ;;  %545 = vmatprep.subr.mxu0 %v250_v26 }
  0x2a   : > { %600 = vmatpush3.msra.mxu1 %v267_v28  ;;  %546 = vmatpush3.msra.mxu0 %v234_v27 }
  0x2b   : > { %601 = vmatprep.subr.mxu1 %v266_v32  ;;  %547 = vmatprep.subr.mxu0 %v249_v31 }
  0x2c   : > { %602 = vmatpush3.msra.mxu1 %v266_v32  ;;  %548 = vmatpush3.msra.mxu0 %v233_v41 }
  0x2d   : > { %603 = vmatprep.subr.mxu1 %v265_v42  ;;  %549 = vmatprep.subr.mxu0 %v248_v44 }
  0x2e   : > { %604 = vmatpush3.msra.mxu1 %v265_v42  ;;  %550 = vmatpush3.msra.mxu0 %v232_v46 }
  0x2f   : > { %605 = vmatprep.subr.mxu1 %v264_v47  ;;  %551 = vmatprep.subr.mxu0 %v247_v48  ;;  %v661_v60 = vpop.eup %660 }
  0x30   : > { %606 = vmatpush3.msra.mxu1 %v264_v47  ;;  %552 = vmatpush3.msra.mxu0 %v231_v49  ;;  %v663_v61 = vpop.eup %662  ;;  %v219_v62 = vmul.f32 0.6931472, %v661_v60 }
  0x31   : > { %607 = vmatprep.subr.mxu1 %v263_v50  ;;  %553 = vmatprep.subr.mxu0 %v246_v51  ;;  %v665_v63 = vpop.eup %664  ;;  %v217_v0 = vmul.f32 0.6931472, %v663_v61 }
  0x32   : > { %608 = vmatpush3.msra.mxu1 %v263_v50  ;;  %554 = vmatpush3.msra.mxu0 %v230_v52  ;;  %v667_v1 = vpop.eup %666  ;;  %v225_v2 = vmul.f32 0.6931472, %v665_v63 }
  0x33   : > { %609 = vmatprep.subr.mxu1 %v262_v53  ;;  %555 = vmatprep.subr.mxu0 %v245_v54  ;;  %v669_v3 = vpop.eup %668  ;;  %v221_v4 = vmul.f32 0.6931472, %v667_v1 }
  0x34   : > { %610 = vmatpush3.msra.mxu1 %v262_v53  ;;  %556 = vmatpush3.msra.mxu0 %v229_v55  ;;  %v223_v6 = vmul.f32 0.6931472, %v669_v3 }
  0x35   : > { %611 = vmatprep.subr.mxu1 %v261_v56  ;;  %557 = vmatprep.subr.mxu0 %v244_v57  ;;  %v671_v5 = vpop.eup %670 }
  0x36   : > { %612 = vmatpush3.msra.mxu1 %v261_v56  ;;  %558 = vmatpush3.msra.mxu0 %v228_v58  ;;  %v227_v7 = vmul.f32 0.6931472, %v671_v5 }
  0x37   : > { %613 = vmatprep.subr.mxu1 %v260_v59  ;;  %343 = vmatprep.mubr.f32.mxu0 %v219_v62 }
  0x38   : > { %614 = vmatpush3.msra.mxu1 %v260_v59  ;;  %344 = vmatmul.mubr.f32.vlgmr.msra.gmra.mxu0 %v217_v0 }
  0x39   : > { %348 = vmatprep.mubr.f32.mxu0 %v225_v2  ;;  %615 = vmatprep.mubr.f32.mxu1 %v221_v4 }
  0x3a   : > { %616 = vmatmul.mubr.f32.vlgmr.msra.gmra.mxu1 %v227_v7 }
  0x3c   : > { %349 = vmatmul.mubr.f32.gmra.mxu0 %v223_v6 }
  0xf8   : > { %v559_v8 = vpop.f32.mrf.mxu0 }
  0xfa   : > { %v560_v9 = vpop.f32.mrf.mxu0  ;;  %v617_v13 = vpop.f32.mrf.mxu1 }
  0xfb   : > { %v561_v11 = vadd.f32 %v560_v9, %v559_v8 }
  0xfc   : > { %v562_v12 = vpop.f32.mrf.mxu0  ;;  %v420_v16 = vpop.f32.mrf.mxu1 }
  0xfd   : > { %v346_v14 = vadd.f32 %v561_v11, %v278_v10 }
  0xfe   : > { %v563_v15 = vpop.f32.mrf.mxu0 }
  0xff   : > { %v564_v17 = vadd.f32 %v563_v15, %v562_v12  ;;  %v421_v18 = vadd.f32 %v420_v16, %v346_v14 }
 0x101   : > { %v351_v19 = vadd.f32 %v564_v17, %v278_v10  ;;  %v429_v20 = vmul.f32 1.442695, %v421_v18 }
 0x103   : > { %v426_v21 = vadd.f32 %v617_v13, %v351_v19  ;;  %672 = vpow2.f32 %v429_v20 }
 0x105   : > { %v431_v22 = vmul.f32 1.442695, %v426_v21 }
 0x107   : > { %674 = vpow2.f32 %v431_v22 }
 0x110   : > { %v673_v24 = vpop.eup %672 }
 0x111   : > { %v434_v25 = vmul.f32 %v673_v24, %v433_v23 }
 0x113   : > { %436 = vst [vmem:[%s195_s16] sm:$0xff] %v434_v25 }
 0x114   : > { %v675_v26 = vpop.eup %674 }
 0x115   : > { %v435_v27 = vmul.f32 %v675_v26, %v433_v23 }
 0x117   : > { %437 = vst [vmem:[%s195_s16 + $0x8] sm:$0xff] %v435_v27 }
 0x118   : > { %689 = shalt.err (!%p686_p3)
}
 0x119   : > { %s690_s14 = scalar_lea.hbm %s984_s25, 256  ;;  %s694_s9 = scalar_lea.hbm %s1032_s4, 512 }
 0x11a   : > { %p691_p4 = scmp.ne.s32.totalorder %s984_s25, %s690_s14  ;;  %p695_p9 = scmp.lt.s32.totalorder %s984_s25, %s1032_s4 }
 0x11b   : > { %p696_p10 = scmp.lt.s32.totalorder %s694_s9, %s690_s14 }
 0x11c   : > { %p692_p7 = pnand %p691_p4, %p810_p5 }
 0x11d   : > { %p697_p11 = por %p696_p10, %p695_p9 }
 0x11e   : > { %p693_p8 = pneg %p692_p7 }
 0x120   : > { %p698_p12 = pnand %p697_p11, %p693_p8 }
 0x122   : > { %701 = shalt.err (!%p698_p12)
}
 0x123   : > { %s739_s11 = smov 128   ;;  %s740_s12 = smov 8  }
 0x124   : > { %619 = dma.vmem_to_hbm [thread:$0]  (%p810_p5), %s986_s17, 256, %s984_s25, %s988_s18, %s739_s11, %s739_s11, %s740_s12  }
 0x125 PF: > { %p625_p13 = scmp.ge.s32.totalorder %s736_s22, 2  ;;  %s467_s13 = sand.u32 1, %s724_s19  }
 0x126   : > { %s468_s15 = scalar_lea.sflag [#allocation5], %s467_s13 }
 0x127   : > { %p622_p0 = pnand %p625_p13, %p814_p6 }
 0x129   : > { %p623_p1 = pneg %p622_p0 }
 0x12b   : > { %719 = dma.done.wait (%p623_p1), %s468_s15, 256  }
 0x12c   : > { %721 = vsyncadd (%p623_p1), %s468_s15, 4294967040  ;;  %p16_p2 = scmp.ge.s32.totalorder %s797_s23, 4   ;;  %s1035_s19 = smov %s728_s20 }
 0x12d   : > { %s1036_s20 = smov %s732_s21  ;;  %s1037_s21 = smov %s808_s26 }
 0x12e   : > { %s1038_s22 = smov %s797_s23  ;;  %18 = sbr.rel (!%p16_p2) target bundleno = 6 (0x6), region = 71 }
 0x133   :  { %473 = vsyncpa [#allocation5], 1 }
 0x134   :  { %475 = vsyncpa [#allocation5 + $0x1], 1 }

</bundles_post_ra>
